<compile_context>
chip_gen: v5e
topology: v5e:2x2
jax: 0.10.0
libtpu: 0.0.40
codegen_flags: <defaults>
</compile_context>

<pallas_src>
import functools

import jax
import jax.numpy as jnp
from jax.experimental import pallas as pl
from jax.experimental.pallas import tpu as pltpu


_NEG_INF = -1e30
_VMEM_LIMIT = 64 * 1024 * 1024


def _round_up(x, m):
    return ((x + m - 1) // m) * m


# ----------------------- qkv projection (head-major out) -----------------------

def _qkv_proj_kernel(x_ref, w_ref, b_ref, o_ref, *, num_heads, head_dim):
    # x: (tS, C)   w: (C, C) for one of q/k/v   b: (1, C)   o: (nh, tS, hd)
    y = jnp.dot(x_ref[...], w_ref[...], preferred_element_type=jnp.float32)
    y = (y + b_ref[...].astype(jnp.float32)).astype(o_ref.dtype)
    # Head split on the small result tile (off the MXU critical path).  This
    # gives the attention kernel lane-dense per-head blocks with no XLA-side
    # qkv permute and no illegal sub-lane BlockSpecs.
    for h in range(num_heads):
        o_ref[h] = y[:, h * head_dim:(h + 1) * head_dim]


def pallas_qkv_proj(x, w3, b3, *, num_heads, head_dim, s_tile):
    B, Sp, C = x.shape
    assert Sp % s_tile == 0
    grid = (3, B, Sp // s_tile)
    flops = 2 * B * Sp * C * 3 * C
    bytes_accessed = (x.size + w3.size + b3.size + 3 * B * Sp * C) * x.dtype.itemsize
    return pl.pallas_call(
        functools.partial(_qkv_proj_kernel, num_heads=num_heads, head_dim=head_dim),
        out_shape=jax.ShapeDtypeStruct((B, 3, num_heads, Sp, head_dim), x.dtype),
        grid=grid,
        in_specs=[
            pl.BlockSpec((None, s_tile, C), lambda which, bb, si: (bb, si, 0)),
            pl.BlockSpec((None, C, C), lambda which, bb, si: (which, 0, 0)),
            pl.BlockSpec((None, 1, C), lambda which, bb, si: (which, 0, 0)),
        ],
        out_specs=pl.BlockSpec((None, None, num_heads, s_tile, head_dim),
                               lambda which, bb, si: (bb, which, 0, si, 0)),
        compiler_params=pltpu.CompilerParams(
            dimension_semantics=("parallel", "parallel", "parallel"),
            vmem_limit_bytes=_VMEM_LIMIT),
        cost_estimate=pl.CostEstimate(flops=int(flops), transcendentals=0,
                                      bytes_accessed=int(bytes_accessed)),
    )(x, w3, b3)


# --------------------- flash attention with fused rel-pos bias ---------------------

def _flash_attn_kernel(q_ref, k_ref, v_ref, rcat_ref, ecat_ref, o_ref,
                       qb_scr, m_scr, l_scr, acc_scr, *, seq_len, kv_tile):
    ki = pl.program_id(3)

    @pl.when(ki == 0)
    def _init():
        m_scr[...] = jnp.full_like(m_scr, -jnp.inf)
        l_scr[...] = jnp.zeros_like(l_scr)
        acc_scr[...] = jnp.zeros_like(acc_scr)
        # Compact per-query rel-pos projection bcat[i, f] = q_i . rcat[i, f, :]
        # (f32 accumulation, rcat stored in bf16).  Computed once per q tile and
        # cached together with q as the fused score-matmul LHS.
        q = q_ref[...]
        rcat = rcat_ref[...].astype(jnp.float32)
        bcat = jnp.sum(q.astype(jnp.float32)[:, None, :] * rcat, axis=-1)
        # TODO(synk): for very large q tiles compute bcat factor-by-factor on the
        #             MXU instead of this VPU broadcast-multiply + lane reduce.
        qb_scr[...] = jnp.concatenate([q, bcat.astype(q.dtype)], axis=-1)

    # Fused scores + rel-pos bias in one MXU pass of depth hd + F:
    #   [q | bcat] @ [k*scale | ecat]^T   (scale pre-folded into the K weights,
    #   so the bias part uses the unscaled q, matching the reference).
    kb = jnp.concatenate([k_ref[...], ecat_ref[...].astype(k_ref.dtype)], axis=-1)
    s = jax.lax.dot_general(qb_scr[...], kb, (((1,), (1,)), ((), ())),
                            preferred_element_type=jnp.float32)          # (tq, tk)

    # Mask padded key columns (sequence padded up to a tile multiple).
    col = jax.lax.broadcasted_iota(jnp.int32, s.shape, 1) + ki * kv_tile
    s = jnp.where(col < seq_len, s, _NEG_INF)

    # Online-softmax (flash) update.
    m_prev = m_scr[...]
    m_new = jnp.maximum(m_prev, jnp.max(s, axis=-1, keepdims=True))
    alpha = jnp.exp(m_prev - m_new)
    p = jnp.exp(s - m_new)
    l_scr[...] = alpha * l_scr[...] + jnp.sum(p, axis=-1, keepdims=True)
    acc_scr[...] = alpha * acc_scr[...] + jnp.dot(
        p.astype(v_ref.dtype), v_ref[...], preferred_element_type=jnp.float32)
    m_scr[...] = m_new

    @pl.when(ki == pl.num_programs(3) - 1)
    def _finalize():
        o_ref[...] = (acc_scr[...]
                      * pl.reciprocal(l_scr[...], approx=True)).astype(o_ref.dtype)


def pallas_flash_attention(qkv, rcat, ecat_t, *, seq_len, q_tile, kv_tile):
    B, _, num_heads, Sp, head_dim = qkv.shape
    F = ecat_t.shape[1]
    assert Sp % q_tile == 0 and Sp % kv_tile == 0
    n_q, n_kv = Sp // q_tile, Sp // kv_tile
    grid = (B, num_heads, n_q, n_kv)
    kernel = functools.partial(_flash_attn_kernel, seq_len=seq_len, kv_tile=kv_tile)
    flops = B * num_heads * (2 * Sp * Sp * (head_dim + F)        # fused scores+bias
                             + 2 * Sp * Sp * head_dim            # p @ v
                             + 2 * Sp * F * head_dim)            # bcat (per q tile)
    transcendentals = B * num_heads * Sp * Sp
    bytes_accessed = (4 * B * num_heads * Sp * head_dim * qkv.dtype.itemsize
                      + rcat.size * rcat.dtype.itemsize
                      + ecat_t.size * ecat_t.dtype.itemsize)
    return pl.pallas_call(
        kernel,
        out_shape=jax.ShapeDtypeStruct((B, num_heads, Sp, head_dim), qkv.dtype),
        grid=grid,
        in_specs=[
            pl.BlockSpec((None, None, None, q_tile, head_dim),
                         lambda b, h, qi, ki: (b, 0, h, qi, 0)),
            pl.BlockSpec((None, None, None, kv_tile, head_dim),
                         lambda b, h, qi, ki: (b, 1, h, ki, 0)),
            pl.BlockSpec((None, None, None, kv_tile, head_dim),
                         lambda b, h, qi, ki: (b, 2, h, ki, 0)),
            pl.BlockSpec((q_tile, F, head_dim), lambda b, h, qi, ki: (qi, 0, 0)),
            pl.BlockSpec((kv_tile, F), lambda b, h, qi, ki: (ki, 0)),
        ],
        out_specs=pl.BlockSpec((None, None, q_tile, head_dim),
                               lambda b, h, qi, ki: (b, h, qi, 0)),
        scratch_shapes=[
            pltpu.VMEM((q_tile, head_dim + F), qkv.dtype),   # [q | bcat] per q tile
            pltpu.VMEM((q_tile, 1), jnp.float32),            # running max
            pltpu.VMEM((q_tile, 1), jnp.float32),            # running denom
            pltpu.VMEM((q_tile, head_dim), jnp.float32),     # output accumulator
        ],
        compiler_params=pltpu.CompilerParams(
            dimension_semantics=("parallel", "parallel", "parallel", "arbitrary"),
            vmem_limit_bytes=_VMEM_LIMIT),
        cost_estimate=pl.CostEstimate(flops=int(flops),
                                      transcendentals=int(transcendentals),
                                      bytes_accessed=int(bytes_accessed)),
    )(qkv, qkv, qkv, rcat, ecat_t)


# -------------------- output projection with head-merge reduction --------------------

def _proj_merge_kernel(x_ref, w_ref, b_ref, o_ref, acc_ref):
    h = pl.program_id(3)

    @pl.when(h == 0)
    def _init():
        acc_ref[...] = jnp.zeros_like(acc_ref)

    acc_ref[...] += jnp.dot(x_ref[...], w_ref[...], preferred_element_type=jnp.float32)

    @pl.when(h == pl.num_programs(3) - 1)
    def _finalize():
        o_ref[...] = (acc_ref[...] + b_ref[...].astype(jnp.float32)).astype(o_ref.dtype)


def pallas_proj_merge(x, w, b, *, s_tile, cout_tile):
    B, num_heads, Sp, head_dim = x.shape
    C = w.shape[-1]
    assert Sp % s_tile == 0 and C % cout_tile == 0
    b2 = b.reshape(1, C)
    grid = (B, Sp // s_tile, C // cout_tile, num_heads)
    flops = 2 * B * Sp * num_heads * head_dim * C
    bytes_accessed = (x.size * (C // cout_tile) + w.size + b2.size
                      + B * Sp * C) * x.dtype.itemsize
    return pl.pallas_call(
        _proj_merge_kernel,
        out_shape=jax.ShapeDtypeStruct((B, Sp, C), x.dtype),
        grid=grid,
        in_specs=[
            pl.BlockSpec((None, None, s_tile, head_dim),
                         lambda bb, si, cj, h: (bb, h, si, 0)),
            pl.BlockSpec((None, head_dim, cout_tile),
                         lambda bb, si, cj, h: (h, 0, cj)),
            pl.BlockSpec((1, cout_tile), lambda bb, si, cj, h: (0, cj)),
        ],
        out_specs=pl.BlockSpec((None, s_tile, cout_tile),
                               lambda bb, si, cj, h: (bb, si, cj)),
        scratch_shapes=[pltpu.VMEM((s_tile, cout_tile), jnp.float32)],
        compiler_params=pltpu.CompilerParams(
            dimension_semantics=("parallel", "parallel", "parallel", "arbitrary"),
            vmem_limit_bytes=_VMEM_LIMIT),
        cost_estimate=pl.CostEstimate(flops=int(flops), transcendentals=0,
                                      bytes_accessed=int(bytes_accessed)),
    )(x, w, b2)


# ------------------------- rel-pos operand precompute ----------------------

def _build_relpos_operands(rel_pos_t, rel_pos_h, rel_pos_w, input_size, seq_pad):
    # q_shape == k_shape in this module => get_rel_pos is an identity and all
    # q/k ratios are 1.  Only O(Sp*(T+H+W)*hd) data is produced here.
    T, H, W = input_size
    N = T * H * W
    idx_t = jnp.arange(T)[:, None] - jnp.arange(T)[None, :] + (T - 1)
    idx_h = jnp.arange(H)[:, None] - jnp.arange(H)[None, :] + (H - 1)
    idx_w = jnp.arange(W)[:, None] - jnp.arange(W)[None, :] + (W - 1)
    Rt = rel_pos_t[idx_t].astype(jnp.float32)   # (T, T, hd)
    Rh = rel_pos_h[idx_h].astype(jnp.float32)   # (H, H, hd)
    Rw = rel_pos_w[idx_w].astype(jnp.float32)   # (W, W, hd)

    tok = jnp.arange(N)
    t_of = tok // (H * W)
    h_of = (tok // W) % H
    w_of = tok % W

    # Per-query gathered tables over the (T, H, W) factors, zero rows for the
    # cls query and the padding queries: (Sp, T+H+W, hd), stored in bf16.
    rcat = jnp.concatenate([Rt[t_of], Rh[h_of], Rw[w_of]], axis=1)
    rcat = jnp.pad(rcat, ((1, seq_pad - N - 1), (0, 0), (0, 0)))

    # Pre-transposed 0/1 expansion (per-key one-hots over the factors); zero
    # rows for the cls key and the padding keys: (Sp, T+H+W).
    Et = (t_of[:, None] == jnp.arange(T)[None, :]).astype(jnp.float32)
    Eh = (h_of[:, None] == jnp.arange(H)[None, :]).astype(jnp.float32)
    Ew = (w_of[:, None] == jnp.arange(W)[None, :]).astype(jnp.float32)
    ecat_t = jnp.concatenate([Et, Eh, Ew], axis=1)
    ecat_t = jnp.pad(ecat_t, ((1, seq_pad - N - 1), (0, 0)))
    return rcat.astype(jnp.bfloat16), ecat_t


# ----------------------------- full forward -------------------------------

def attention_rel_pos_with_cls(x, params, input_size, num_heads, scale, *,
                               seq_tile=128, cout_tile=512):
    T, H, W = input_size
    N = T * H * W
    B, S0, C = x.shape
    assert S0 == N + 1
    hd = C // num_heads

    # ---- one-time parameter transforms (free relative to the forward pass) ----
    # qkv weight -> (3, C, C), scale folded into the K slab so the kernel never
    # multiplies by `scale` and the rel-pos bias keeps the unscaled q.
    w3 = params["w_qkv"].reshape(C, 3, C).transpose(1, 0, 2)
    b3 = params["b_qkv"].reshape(3, 1, C)
    sfold = jnp.array([1.0, scale, 1.0], dtype=w3.dtype).reshape(3, 1, 1)
    w3 = w3 * sfold
    b3 = b3 * sfold
    # proj weight -> (nh, hd, C): heads re-merged by the projection kernel's
    # reduction axis (no head-merge transpose through HBM).
    wp = params["w_proj"].reshape(num_heads, hd, C)
    bp = params["b_proj"]

    # ---- pad the sequence once to a tile multiple; padded keys are masked
    #      in-kernel and padded query rows are sliced off at the end. ----
    seq_tile = min(seq_tile, _round_up(S0, 8))
    Sp = _round_up(S0, seq_tile)
    cout_tile = cout_tile if (C % cout_tile == 0) else C
    x_p = jnp.pad(x, ((0, 0), (0, Sp - S0), (0, 0)))

    qkv = pallas_qkv_proj(x_p, w3, b3, num_heads=num_heads, head_dim=hd,
                          s_tile=seq_tile)                          # (B, 3, nh, Sp, hd)
    rcat, ecat_t = _build_relpos_operands(params["rel_pos_t"], params["rel_pos_h"],
                                          params["rel_pos_w"], input_size, Sp)
    attn = pallas_flash_attention(qkv, rcat, ecat_t, seq_len=S0,
                                  q_tile=seq_tile, kv_tile=seq_tile)  # (B, nh, Sp, hd)
    out = pallas_proj_merge(attn, wp, bp, s_tile=seq_tile,
                            cout_tile=cout_tile)                      # (B, Sp, C)
    return out[:, :S0, :]


# ------------------------- pure-JAX reference ------------------------------

def reference_forward(x, p, input_size, num_heads, scale):
    hp = jax.lax.Precision.HIGHEST
    T, H, W = input_size
    N = T * H * W
    B, seq, C = x.shape
    hd = C // num_heads

    qkv = jnp.einsum("bsc,cd->bsd", x, p["w_qkv"], precision=hp) + p["b_qkv"]
    qkv = qkv.reshape(B, seq, 3, num_heads, hd).transpose(2, 0, 3, 1, 4)
    q, k, v = qkv[0], qkv[1], qkv[2]
    attn = jnp.einsum("bhqd,bhkd->bhqk", q, k, precision=hp) * scale

    idx_h = jnp.arange(H)[:, None] - jnp.arange(H)[None, :] + (H - 1)
    idx_w = jnp.arange(W)[:, None] - jnp.arange(W)[None, :] + (W - 1)
    idx_t = jnp.arange(T)[:, None] - jnp.arange(T)[None, :] + (T - 1)
    Rh, Rw, Rt = p["rel_pos_h"][idx_h], p["rel_pos_w"][idx_w], p["rel_pos_t"][idx_t]

    r_q = q[:, :, 1:].reshape(B, num_heads, T, H, W, hd)
    rel_h = jnp.einsum("bythwc,hkc->bythwk", r_q, Rh, precision=hp)
    rel_w = jnp.einsum("bythwc,wkc->bythwk", r_q, Rw, precision=hp)
    rel_t = jnp.einsum("bythwc,tkc->bythwk", r_q, Rt, precision=hp)

    attn_sp = attn[:, :, 1:, 1:].reshape(B, num_heads, T, H, W, T, H, W)
    attn_sp = (attn_sp
               + rel_h[:, :, :, :, :, None, :, None]
               + rel_w[:, :, :, :, :, None, None, :]
               + rel_t[:, :, :, :, :, :, None, None])
    attn = attn.at[:, :, 1:, 1:].set(attn_sp.reshape(B, num_heads, N, N))
    attn = jax.nn.softmax(attn, axis=-1)

    out = jnp.einsum("bhqk,bhkd->bhqd", attn, v, precision=hp)
    out = out.transpose(0, 2, 1, 3).reshape(B, seq, C)
    out = jnp.einsum("bsc,cd->bsd", out, p["w_proj"], precision=hp) + p["b_proj"]
    return out


# --------------------------------- main ------------------------------------

if __name__ == "__main__":
    # Small shapes consistent with the module: input_size=(T, H, W), H == W,
    # seq = T*H*W + 1 (cls token), dim divisible by num_heads.
    T, H, W = 2, 4, 4
    dim = 32
    num_heads = 4
    B = 2
    N = T * H * W
    hd = dim // num_heads
    scale = hd ** -0.5

    key = jax.random.PRNGKey(0)
    k1, k2, k3, k4, k5, k6, kx = jax.random.split(key, 7)
    params = {
        # qkv: nn.Linear(dim, 3*dim, bias=False)  -> zero bias
        "w_qkv": jax.random.normal(k1, (dim, 3 * dim), jnp.float32) * (dim ** -0.5),
        "b_qkv": jnp.zeros((3 * dim,), jnp.float32),
        # proj: nn.Linear(dim, dim)
        "w_proj": jax.random.normal(k2, (dim, dim), jnp.float32) * (dim ** -0.5),
        "b_proj": jax.random.normal(k3, (dim,), jnp.float32) * 0.02,
        # rel pos tables: (2*H-1, hd), (2*W-1, hd), (2*T-1, hd)
        "rel_pos_h": jax.random.normal(k4, (2 * H - 1, hd), jnp.float32) * 0.02,
        "rel_pos_w": jax.random.normal(k5, (2 * W - 1, hd), jnp.float32) * 0.02,
        "rel_pos_t": jax.random.normal(k6, (2 * T - 1, hd), jnp.float32) * 0.02,
    }

    x = jax.random.normal(kx, (B, N + 1, dim), jnp.float32)

    # seq_tile=16 exercises the multi-tile flash path (33 padded to 48 => 3 q
    # tiles x 3 kv tiles, padded keys masked in-kernel).
    out = attention_rel_pos_with_cls(x, params, (T, H, W), num_heads, scale,
                                     seq_tile=16)
    out = jax.block_until_ready(out)

    ref = reference_forward(x, params, (T, H, W), num_heads, scale)
    assert out.shape == (B, N + 1, dim)
    assert bool(jnp.all(jnp.isfinite(out)))
    max_err = float(jnp.max(jnp.abs(out - ref)))
    assert max_err < 1e-2, f"max abs err too large: {max_err}"
    print("KERNEL_OK")
</pallas_src>

<mosaic_0001>
module attributes {stable_mosaic.version = 11 : i64} {
  func.func @_qkv_proj_kernel(%arg0: i32, %arg1: i32, %arg2: i32, %arg3: memref<1x16x32xf32, #tpu.memory_space<vmem>>, %arg4: memref<1x32x32xf32, #tpu.memory_space<vmem>>, %arg5: memref<1x1x32xf32, #tpu.memory_space<vmem>>, %arg6: memref<1x1x4x16x8xf32, #tpu.memory_space<vmem>>) attributes {dimension_semantics = [#tpu.dimension_semantics<parallel>, #tpu.dimension_semantics<parallel>, #tpu.dimension_semantics<parallel>], iteration_bounds = array<i64: 3, 2, 3>, scalar_prefetch = 0 : i64, scratch_operands = 0 : i64, tpu.core_type = #tpu.core_type<tc>, window_params = [{transform_indices = @transform_0, window_bounds = array<i64: 1, 16, 32>}, {transform_indices = @transform_1, window_bounds = array<i64: 1, 32, 32>}, {transform_indices = @transform_2, window_bounds = array<i64: 1, 1, 32>}, {transform_indices = @transform_3, window_bounds = array<i64: 1, 1, 4, 16, 8>}]} {
    %c0 = arith.constant 0 : index
    %c0_0 = arith.constant 0 : index
    %c0_1 = arith.constant 0 : index
    %0 = vector.load %arg3[%c0, %c0_0, %c0_1] : memref<1x16x32xf32, #tpu.memory_space<vmem>>, vector<1x16x32xf32>
    %1 = vector.shape_cast %0 : vector<1x16x32xf32> to vector<16x32xf32>
    %c0_2 = arith.constant 0 : index
    %c0_3 = arith.constant 0 : index
    %c0_4 = arith.constant 0 : index
    %2 = vector.load %arg4[%c0_2, %c0_3, %c0_4] : memref<1x32x32xf32, #tpu.memory_space<vmem>>, vector<1x32x32xf32>
    %3 = vector.shape_cast %2 : vector<1x32x32xf32> to vector<32x32xf32>
    %cst = arith.constant dense<0.000000e+00> : vector<16x32xf32>
    %4 = tpu.matmul %1, %3, %cst {dimension_numbers = #tpu.dot_dimension_numbers<[1], [0], [0], [1], [0, 0, 1, 1], [], []>} : vector<16x32xf32>, vector<32x32xf32>, vector<16x32xf32> -> vector<16x32xf32>
    %c0_5 = arith.constant 0 : index
    %c0_6 = arith.constant 0 : index
    %c0_7 = arith.constant 0 : index
    %5 = vector.load %arg5[%c0_5, %c0_6, %c0_7] : memref<1x1x32xf32, #tpu.memory_space<vmem>>, vector<1x1x32xf32>
    %6 = vector.shape_cast %5 : vector<1x1x32xf32> to vector<1x32xf32>
    %7 = vector.broadcast %6 : vector<1x32xf32> to vector<16x32xf32>
    %8 = arith.addf %4, %7 : vector<16x32xf32>
    %9 = vector.extract_strided_slice %8 {offsets = [0, 0], sizes = [16, 8], strides = [1, 1]} : vector<16x32xf32> to vector<16x8xf32>
    %c0_8 = arith.constant 0 : index
    %c0_9 = arith.constant 0 : index
    %c0_10 = arith.constant 0 : index
    %c0_11 = arith.constant 0 : index
    %c0_12 = arith.constant 0 : index
    %10 = vector.load %arg6[%c0_8, %c0_9, %c0_10, %c0_11, %c0_12] : memref<1x1x4x16x8xf32, #tpu.memory_space<vmem>>, vector<1x1x1x16x8xf32>
    %11 = vector.shape_cast %10 : vector<1x1x1x16x8xf32> to vector<16x8xf32>
    %12 = vector.shape_cast %9 : vector<16x8xf32> to vector<1x1x1x16x8xf32>
    tpu.vector_store %arg6[%c0_8, %c0_9, %c0_10, %c0_11, %c0_12], %12 {strides = array<i32>} : memref<1x1x4x16x8xf32, #tpu.memory_space<vmem>>, vector<1x1x1x16x8xf32>,
    %13 = vector.extract_strided_slice %8 {offsets = [0, 8], sizes = [16, 8], strides = [1, 1]} : vector<16x32xf32> to vector<16x8xf32>
    %c0_13 = arith.constant 0 : index
    %c0_14 = arith.constant 0 : index
    %c1 = arith.constant 1 : index
    %c0_15 = arith.constant 0 : index
    %c0_16 = arith.constant 0 : index
    %14 = vector.load %arg6[%c0_13, %c0_14, %c1, %c0_15, %c0_16] : memref<1x1x4x16x8xf32, #tpu.memory_space<vmem>>, vector<1x1x1x16x8xf32>
    %15 = vector.shape_cast %14 : vector<1x1x1x16x8xf32> to vector<16x8xf32>
    %16 = vector.shape_cast %13 : vector<16x8xf32> to vector<1x1x1x16x8xf32>
    tpu.vector_store %arg6[%c0_13, %c0_14, %c1, %c0_15, %c0_16], %16 {strides = array<i32>} : memref<1x1x4x16x8xf32, #tpu.memory_space<vmem>>, vector<1x1x1x16x8xf32>,
    %17 = vector.extract_strided_slice %8 {offsets = [0, 16], sizes = [16, 8], strides = [1, 1]} : vector<16x32xf32> to vector<16x8xf32>
    %c0_17 = arith.constant 0 : index
    %c0_18 = arith.constant 0 : index
    %c2 = arith.constant 2 : index
    %c0_19 = arith.constant 0 : index
    %c0_20 = arith.constant 0 : index
    %18 = vector.load %arg6[%c0_17, %c0_18, %c2, %c0_19, %c0_20] : memref<1x1x4x16x8xf32, #tpu.memory_space<vmem>>, vector<1x1x1x16x8xf32>
    %19 = vector.shape_cast %18 : vector<1x1x1x16x8xf32> to vector<16x8xf32>
    %20 = vector.shape_cast %17 : vector<16x8xf32> to vector<1x1x1x16x8xf32>
    tpu.vector_store %arg6[%c0_17, %c0_18, %c2, %c0_19, %c0_20], %20 {strides = array<i32>} : memref<1x1x4x16x8xf32, #tpu.memory_space<vmem>>, vector<1x1x1x16x8xf32>,
    %21 = vector.extract_strided_slice %8 {offsets = [0, 24], sizes = [16, 8], strides = [1, 1]} : vector<16x32xf32> to vector<16x8xf32>
    %c0_21 = arith.constant 0 : index
    %c0_22 = arith.constant 0 : index
    %c3 = arith.constant 3 : index
    %c0_23 = arith.constant 0 : index
    %c0_24 = arith.constant 0 : index
    %22 = vector.load %arg6[%c0_21, %c0_22, %c3, %c0_23, %c0_24] : memref<1x1x4x16x8xf32, #tpu.memory_space<vmem>>, vector<1x1x1x16x8xf32>
    %23 = vector.shape_cast %22 : vector<1x1x1x16x8xf32> to vector<16x8xf32>
    %24 = vector.shape_cast %21 : vector<16x8xf32> to vector<1x1x1x16x8xf32>
    tpu.vector_store %arg6[%c0_21, %c0_22, %c3, %c0_23, %c0_24], %24 {strides = array<i32>} : memref<1x1x4x16x8xf32, #tpu.memory_space<vmem>>, vector<1x1x1x16x8xf32>,
    return
  }
  func.func @transform_0(%arg0: i32, %arg1: i32, %arg2: i32) -> (i32, i32, i32) {
    %c0_i32 = arith.constant 0 : i32
    %c0_i32_0 = arith.constant 0 : i32
    return %arg1, %arg2, %c0_i32 : i32, i32, i32
  }
  func.func @transform_1(%arg0: i32, %arg1: i32, %arg2: i32) -> (i32, i32, i32) {
    %c0_i32 = arith.constant 0 : i32
    %c0_i32_0 = arith.constant 0 : i32
    %c0_i32_1 = arith.constant 0 : i32
    return %arg0, %c0_i32, %c0_i32_0 : i32, i32, i32
  }
  func.func @transform_2(%arg0: i32, %arg1: i32, %arg2: i32) -> (i32, i32, i32) {
    %c0_i32 = arith.constant 0 : i32
    %c0_i32_0 = arith.constant 0 : i32
    %c0_i32_1 = arith.constant 0 : i32
    return %arg0, %c0_i32, %c0_i32_0 : i32, i32, i32
  }
  func.func @transform_3(%arg0: i32, %arg1: i32, %arg2: i32) -> (i32, i32, i32, i32, i32) {
    %c0_i32 = arith.constant 0 : i32
    %c0_i32_0 = arith.constant 0 : i32
    %c0_i32_1 = arith.constant 0 : i32
    return %arg1, %arg0, %c0_i32, %arg2, %c0_i32_0 : i32, i32, i32, i32, i32
  }
}

</mosaic_0001>

<bundles_post_ra>
// kernel: tpu_custom_call.1
= control target key start
LH: loop header
LB: loop body
LE: loop exit
PB: predicated region body
PF: predicated region fallthrough
CT: control target
= control target key end

     0   :  { %s688_s12 = smov 0   ;;  %s690_s13 = smov 0   ;;  %s847_s0 = inlined_call_operand.vmem [shape: f32[2,48,32], index: 0, kind: input, shape index: {}]   ;;  %s848_s1 = inlined_call_operand.vmem [shape: f32[3,32,32], index: 1, kind: input, shape index: {}]   ;;  %s849_s2 = inlined_call_operand.vmem [shape: f32[3,1,32], index: 2, kind: input, shape index: {}]   ;;  %s850_s3 = inlined_call_operand.vmem [shape: f32[2,3,4,48,8], index: 3, kind: output, shape index: {}]  }
   0x1   :  { %s692_s14 = smov 0   ;;  %s694_s15 = smov 0  }
   0x2   :  { %s696_s16 = smov 0   ;;  %s698_s17 = smov 0  }
   0x3   :  { %s700_s18 = smov 0   ;;  %s702_s19 = smov 0  }
   0x4   :  { %s704_s20 = smov 0  }
   0x5 LB: > { %s25_s21 = sadd.s32 1, %s651_s17  ;;  %s28_s22 = sadd.s32 1, %s655_s18  ;;  %s663_s20 = sphi %s704_s20, %s13_s20   ;;  %s659_s19 = sphi %s702_s19, %s862_s19   ;;  %s655_s18 = sphi %s700_s18, %s861_s18   ;;  %s651_s17 = sphi %s698_s17, %s860_s17   ;;  %s647_s16 = sphi %s696_s16, %s859_s16   ;;  %s643_s15 = sphi %s694_s15, %s858_s15   ;;  %s639_s14 = sphi %s692_s14, %s857_s14   ;;  %s635_s13 = sphi %s690_s13, %s856_s13   ;;  %s631_s12 = sphi %s688_s12, %s855_s12  }
   0x6   : > { %p26_p0 = scmp.ge.s32.totalorder %s25_s21, 3  ;;  %s486_s23 = sadd.s32 4294967295, %s663_s20  }
   0x7   : > { %s32_s24 = sadd.s32 1, %s659_s19  ;;  %p133_p1 = scmp.ne.s32.totalorder %s635_s13, %s631_s12 }
   0x8   : > { %s864_s21 = smov (%p26_p0, %s25_s21), 0  ;;  %s866_s22 = smov (!%p26_p0, %s28_s22), %s655_s18 }
   0x9   : > { %p30_p2 = scmp.ge.s32.totalorder %s866_s22, 2  ;;  %p134_p3 = scmp.eq.s32.totalorder %s486_s23, 17 }
   0xa   : > { %p490_p4 = scmp.ge.s32.totalorder %s663_s20, 1  ;;  %p185_p5 = scmp.lt.s32.totalorder %s663_s20, 19 }
   0xb   : > { %s868_s22 = smov (%p30_p2, %s866_s22), 0  ;;  %s870_s24 = smov (!%p30_p2, %s32_s24), %s659_s19 }
   0xc   : > { %p747_p6 = por %p134_p3, %p133_p1  ;;  %p34_p7 = scmp.ge.s32.totalorder %s870_s24, 3 }
   0xd   : > { %p186_p8 = pnand %p490_p4, %p185_p5  ;;  %s116_s26 = ssub.s32 %s655_s18, %s868_s22 }
   0xe   : > { %s872_s24 = smov (%p34_p7, %s870_s24), 0  ;;  %s119_s27 = ssub.s32 %s651_s17, %s864_s21 }
   0xf   : > { %853 = sst [smem:[#allocation3_spill]] %s872_s24  ;;  %s117_s28 = ssub.s32 %s659_s19, %s872_s24 }
  0x10   : > { %s118_s29 = sor.u32 %s117_s28, %s116_s26  ;;  %s123_s4 = sadd.s32 1, %s635_s13 }
  0x11   : > { %s120_s30 = sor.u32 %s119_s27, %s118_s29  ;;  %189 = sbr.rel (%p186_p8) target bundleno = 295 (0x127), region = 32 }
  0x12   : > { %p121_p9 = scmp.eq.s32.totalorder %s120_s30, 0  ;;  %p230_p10 = scmp.lt.s32.totalorder (!%p186_p8), %s647_s16, 2 }
  0x13   : > { %s765_s6 = sshll.u32 (!%p186_p8), %s639_s14, 1  ;;  %p221_p11 = scmp.lt.s32.totalorder (!%p186_p8), %s643_s15, 1 }
  0x14   : > { %s761_s5 = scalar_select %p121_p9, %s635_s13, %s123_s4  }
  0x15   : > { %p223_p12 = scmp.lt.s32.totalorder (!%p186_p8), %s765_s6, 5  ;;  %s665_s24 = smov (!%p186_p8), 104  }
  0x16   : > { %s770_s7 = scalar_select %p230_p10, %s647_s16, 2  ;;  %vm249_vm0 = vcmask 261120   ;;  %vm279_vm1 = vcmask 64512  }
  0x17   : > { %s222_s8 = scalar_select %p221_p11, %s643_s15, 1 }
  0x18   : > { %s509_s9 = sshll.u32 %s770_s7, 5  ;;  %s237_s29 = scalar_lea.vmem %s849_s2, %s770_s7 }
  0x19   : > { %s234_s23 = scalar_lea.vmem %s848_s1, %s509_s9  ;;  %s514_s26 = smul.u32 6, %s222_s8  ;;  %v592_v6 = vld [vmem:[%s237_s29] ss:$0 sm:$0xff] }
  0x1a   : > { %v244_v0 = vld [vmem:[%s234_s23 + $0x18] sm:$0xff]  ;;  %v243_v1 = vld [vmem:[%s234_s23 + $0x10] sm:$0xff]  ;;  %s224_s27 = scalar_select %p223_p12, %s765_s6, 5  ;;  %v242_v2 = vld [vmem:[%s234_s23 + $0x8] sm:$0xff] }
  0x1b   : > { %268 = vmatpush.msra.mxu0 %v244_v0  ;;  %510 = vmatpush.msra.mxu1 %v244_v0  ;;  %v241_v3 = vld [vmem:[%s234_s23] sm:$0xff]  ;;  %s217_s7 = sand.u32 1, %s631_s12   ;;  %s666_s12 = smov 112  }
  0x1c   : > { %s226_s30 = sadd.s32 %s514_s26, %s224_s27  ;;  %s491_s9 = sshll.u32 %s217_s7, 6 }
  0x1d   : > { %269 = vmatpush.msra.mxu0 %v243_v1  ;;  %s493_s4 = sshll.u32 %s226_s30, 3  ;;  %511 = vmatpush.msra.mxu1 %v243_v1  ;;  %s786_s11 = scalar_lea.vmem [#allocation2], %s491_s9 }
  0x1e   : > { %s228_s8 = scalar_lea.vmem %s847_s0, %s493_s4  ;;  %s667_s23 = smov 120  }
  0x1f   : > { %270 = vmatpush.msra.mxu0 %v242_v2  ;;  %v239_v4 = vld [vmem:[%s228_s8] sm:$0xff]  ;;  %512 = vmatpush.msra.mxu1 %v242_v2  ;;  %v240_v5 = vld [vmem:[%s228_s8 + $0x8] sm:$0xff]  ;;  %s515_s26 = smul.u32 (%p747_p6), 24, %s647_s16 }
  0x20   : > { %s516_s27 = smul.u32 (%p747_p6), 72, %s643_s15 }
  0x21   : > { %271 = vmatpush.msra.mxu0 %v241_v3  ;;  %513 = vmatpush.msra.mxu1 %v241_v3  ;;  %s320_s14 = sadd.s32 (%p747_p6), %s515_s26, %s765_s6 }
  0x22   : > { %496 = vmatmul.msk.f32.vlgmr.msra.gmra.mxu0 %vm249_vm0, %v239_v4  ;;  %497 = vmatmul.msk.f32.vlgmr.msra.gmra.mxu1 %vm249_vm0, %v240_v5  ;;  %s322_s28 = sadd.s32 (%p747_p6), %s516_s27, %s320_s14 }
  0x23   : > { %s506_s29 = sshll.u32 (%p747_p6), %s322_s28, 3 }
  0x24   : > { %s324_s4 = scalar_lea.vmem (%p747_p6), %s850_s3, %s506_s29 }
  0x9f   : > { %v273_v7 = vpop.f32.mrf.mxu0  ;;  %v276_v8 = vpop.f32.mrf.mxu1 }
  0xa0   : > { %v274_v9 = vadd.f32 %v592_v6, %v273_v7  ;;  %v277_v10 = vadd.f32 %v592_v6, %v276_v8 }
  0xa2   : > { %280 = vst.msk [vmem:[%s786_s11] sm:$0xff] %vm279_vm1, %v274_v9  ;;  %302 = vrot.lane.b32.xlu2 %v274_v9, %s665_s24  ;;  %293 = vrot.lane.b32.xlu1 %v274_v9, %s666_s12 }
  0xa3   : > { %284 = vrot.lane.b32.xlu0 %v274_v9, %s667_s23  ;;  %281 = vst.msk [vmem:[%s786_s11 + $0x8] sm:$0xff] %vm279_vm1, %v277_v10 }
  0xa9   : > { %v367_v17 = vld [vmem:[%s786_s11] sm:$0xff] (%p747_p6) }
  0xaa   : > { %304 = vrot.lane.b32.xlu2 %v277_v10, %s665_s24  ;;  %295 = vrot.lane.b32.xlu1 %v277_v10, %s666_s12  ;;  %v369_v18 = vld [vmem:[%s786_s11 + $0x8] sm:$0xff] (%p747_p6)  ;;  %368 = vst [vmem:[%s324_s4] sm:$0xff] (%p747_p6), %v367_v17 }
  0xab   : > { %286 = vrot.lane.b32.xlu0 %v277_v10, %s667_s23  ;;  %370 = vst [vmem:[%s324_s4 + $0x8] sm:$0xff] (%p747_p6), %v369_v18 }
  0xfc   : > { %v303_v11 = vpop.permute.xlu2 %302 }
  0xfd   : > { %502 = vst.msk [vmem:[%s786_s11 + $0x30] sm:$0xff] %vm279_vm1, %v303_v11 }
 0x104   : > { %v305_v12 = vpop.permute.xlu2 %304  ;;  %v379_v23 = vld [vmem:[%s786_s11 + $0x30] sm:$0xff] (%p747_p6) }
 0x105   : > { %503 = vst.msk [vmem:[%s786_s11 + $0x38] sm:$0xff] %vm279_vm1, %v305_v12 }
 0x106   : > { %380 = vst [vmem:[%s324_s4 + $0x90] sm:$0xff] (%p747_p6), %v379_v23 }
 0x10c   : > { %v381_v24 = vld [vmem:[%s786_s11 + $0x38] sm:$0xff] (%p747_p6) }
 0x10d   : > { %382 = vst [vmem:[%s324_s4 + $0x98] sm:$0xff] (%p747_p6), %v381_v24 }
 0x114   : > { %v294_v13 = vpop.permute.xlu1 %293 }
 0x115   : > { %500 = vst.msk [vmem:[%s786_s11 + $0x20] sm:$0xff] %vm279_vm1, %v294_v13  ;;  %v285_v14 = vpop.permute.xlu0 %284 }
 0x116   : > { %498 = vst.msk [vmem:[%s786_s11 + $0x10] sm:$0xff] %vm279_vm1, %v285_v14 }
 0x11a   : > { %317 = sbr.rel (!%p747_p6) target bundleno = 295 (0x127), region = 36 }
 0x11c   : > { %v296_v15 = vpop.permute.xlu1 %295  ;;  %v375_v21 = vld [vmem:[%s786_s11 + $0x20] sm:$0xff] (%p747_p6) }
 0x11d   : > { %501 = vst.msk [vmem:[%s786_s11 + $0x28] sm:$0xff] %vm279_vm1, %v296_v15  ;;  %v287_v16 = vpop.permute.xlu0 %286  ;;  %v371_v19 = vld [vmem:[%s786_s11 + $0x10] sm:$0xff] (%p747_p6) }
 0x11e   : > { %499 = vst.msk [vmem:[%s786_s11 + $0x18] sm:$0xff] %vm279_vm1, %v287_v16 }
 0x11f   : > { %372 = vst [vmem:[%s324_s4 + $0x30] sm:$0xff] %v371_v19 }
 0x120   : > { %376 = vst [vmem:[%s324_s4 + $0x60] sm:$0xff] %v375_v21 }
 0x124   : > { %v377_v22 = vld [vmem:[%s786_s11 + $0x28] sm:$0xff] }
 0x125   : > { %v373_v20 = vld [vmem:[%s786_s11 + $0x18] sm:$0xff]  ;;  %378 = vst [vmem:[%s324_s4 + $0x68] sm:$0xff] %v377_v22 }
 0x126   : > { %374 = vst [vmem:[%s324_s4 + $0x38] sm:$0xff] %v373_v20 }
 0x127 PF: > { %s13_s20 = sadd.s32 1, %s663_s20   ;;  %s854_s6 = sld [smem:[#allocation3_spill]] }
 0x128   : > { %p10_p13 = scmp.ge.s32.totalorder %s13_s20, 20   ;;  %s855_s12 = smov %s635_s13 }
 0x129   : > { %s856_s13 = smov %s761_s5  ;;  %s857_s14 = smov %s651_s17 }
 0x12a   : > { %s858_s15 = smov %s655_s18  ;;  %s859_s16 = smov %s659_s19 }
 0x12b   : > { %s860_s17 = smov %s864_s21  ;;  %s861_s18 = smov %s868_s22 }
 0x12c   :  { %12 = sbr.rel (!%p10_p13) target bundleno = 5 (0x5), region = 109 }
 0x12d   : > { %s862_s19 = smov %s854_s6 }

</bundles_post_ra>
